<compile_context>
chip_gen: v7x
topology: tpu7x:2x2x1
jax: 0.10.0
libtpu: 0.0.40
codegen_flags: <defaults>
</compile_context>

<pallas_src>
import functools

import jax
import jax.numpy as jnp
from jax import lax
from jax.experimental import pallas as pl
from jax.experimental.pallas import tpu as pltpu


def _vmem_capacity_bytes():
    """Per-core VMEM capacity; conservative default if the query is unavailable."""
    try:
        return int(pltpu.get_tpu_info().vmem_capacity_bytes)
    except Exception:
        return 64 * 1024 * 1024  # v7x per-core VMEM (smallest of v5e/v6e/v7x)


def _ceil_to(v, m):
    return -(-v // m) * m


def _sublane_multiple(esize):
    return {4: 8, 2: 16, 1: 32}.get(esize, 8)


def _choose_inner_shape(t, hw, sublane):
    """Factor T*H*W into (S, L) with L a multiple of 128 (unmasked lane-dense stores).

    Preference: S a multiple of the dtype sublane packing (no layout padding), then
    S a multiple of 8, then the largest such L.  Falls back to (T, H*W) (masked
    stores but still correct) when T*H*W has no multiple-of-128 factor.
    """
    thw = t * hw
    best_key, best = None, None
    l = 128
    while l <= thw:
        if thw % l == 0:
            s = thw // l
            key = (s % sublane == 0, s % 8 == 0, l)
            if best_key is None or key > best_key:
                best_key, best = key, (s, l)
        l += 128
    if best is None:
        return t, hw
    return best


def _largest_divisor_leq(n, cap):
    cap = max(1, min(n, cap))
    for d in range(cap, 0, -1):
        if n % d == 0:
            return d
    return 1


# ----------------------------------------------------------------------------
# Fused single-pass kernel: one whole channel (N, 1, S, L) resident in VMEM.
# Stats + normalize in one shot -> exactly 1 HBM read + 1 HBM write of x.
# Per-sample fori_loop sweeps keep VMEM temps to O(one sample row) so large
# channel slabs still qualify for this path.
# ----------------------------------------------------------------------------
def _bn_fused_kernel(w_ref, b_ref, x_ref, xs_ref, o_ref, *, prior, eps):
    c = pl.program_id(0)
    n, _, s_dim, l_dim = x_ref.shape
    cnt_f = float(n * s_dim * l_dim)
    cnt_s = float(xs_ref.shape[0] * xs_ref.shape[-1])

    # Full (spatio-temporal) statistics: centered two-sweep form over the VMEM-resident
    # ref (VMEM re-reads are free relative to HBM), accumulated in f32.
    def sum_body(i, acc):
        return acc + jnp.sum(x_ref[i].astype(jnp.float32))
    mean_f = lax.fori_loop(0, n, sum_body, jnp.zeros((), jnp.float32)) / cnt_f

    def m2_body(i, acc):
        d = x_ref[i].astype(jnp.float32) - mean_f
        return acc + jnp.sum(d * d)
    var_f = lax.fori_loop(0, n, m2_body, jnp.zeros((), jnp.float32)) / (cnt_f - 1.0)

    # Slice (t == slice_idx) statistics: dedicated tiny input block, centered form.
    xs = xs_ref[...].astype(jnp.float32)
    mean_s = jnp.sum(xs) / cnt_s
    dsl = xs - mean_s
    var_s = jnp.sum(dsl * dsl) / (cnt_s - 1.0)

    # Blend with prior and normalize (stats math in f32, I/O in the input dtype).
    mean = prior * mean_f + (1.0 - prior) * mean_s
    var = prior * var_f + (1.0 - prior) * var_s
    scale = w_ref[c] * lax.rsqrt(var + eps)
    shift = b_ref[c] - mean * scale

    def norm_body(i, carry):
        o_ref[i] = (x_ref[i].astype(jnp.float32) * scale + shift).astype(o_ref.dtype)
        return carry
    lax.fori_loop(0, n, norm_body, 0)


# ----------------------------------------------------------------------------
# Tiled two-pass path (VMEM-safe for very large N*T*H*W).
# Pass 1: per-(channel, N-chunk) partial sums + centered M2, packed into a single
#         (8,128) tile per grid step (both grid axes fully parallel).
# Pass 2: y = x * scale[c] + shift[c].
# ----------------------------------------------------------------------------
def _bn_stats_kernel(x_ref, xs_ref, stat_ref):
    nb, _, s_dim, l_dim = x_ref.shape
    cnt_f = float(nb * s_dim * l_dim)
    cnt_s = float(xs_ref.shape[0] * xs_ref.shape[-1])

    def sum_body(i, acc):
        return acc + jnp.sum(x_ref[i].astype(jnp.float32))
    s_full = lax.fori_loop(0, nb, sum_body, jnp.zeros((), jnp.float32))
    mu_f = s_full / cnt_f

    def m2_body(i, acc):
        d = x_ref[i].astype(jnp.float32) - mu_f
        return acc + jnp.sum(d * d)
    m2_full = lax.fori_loop(0, nb, m2_body, jnp.zeros((), jnp.float32))

    xs = xs_ref[...].astype(jnp.float32)
    s_sl = jnp.sum(xs)
    mu_s = s_sl / cnt_s
    dsl = xs - mu_s
    m2_sl = jnp.sum(dsl * dsl)

    # Pack the 4 partial statistics into one (8,128) tile: sublane k holds stat k.
    row = lax.broadcasted_iota(jnp.int32, (8, 128), 0)
    tile = jnp.where(row == 0, s_full,
           jnp.where(row == 1, m2_full,
           jnp.where(row == 2, s_sl, m2_sl)))
    stat_ref[...] = tile.reshape(1, 1, 8, 128)


def _bn_norm_kernel(scale_ref, shift_ref, x_ref, o_ref):
    c = pl.program_id(0)
    scale = scale_ref[c]
    shift = shift_ref[c]
    nb = x_ref.shape[0]

    def body(i, carry):
        o_ref[i] = (x_ref[i].astype(jnp.float32) * scale + shift).astype(o_ref.dtype)
        return carry
    lax.fori_loop(0, nb, body, 0)


# ----------------------------------------------------------------------------
# Public wrapper.
# ----------------------------------------------------------------------------
def bayesian_batchnorm3d_spatial_temporal(x, weight, bias, *, prior, eps=1e-5,
                                          slice_idx=8, force_tiled=False):
    """x: (N, C, T, H, W) (PyTorch NCDHW); weight/bias: (C,).  Output dtype == x dtype."""
    N, C, T, H, W = x.shape
    assert T > slice_idx, "temporal dim must exceed the slice index"
    HW = H * W
    THW = T * HW

    esize = jnp.dtype(x.dtype).itemsize
    sub = _sublane_multiple(esize)
    S, L = _choose_inner_shape(T, HW, sub)
    S_pad = _ceil_to(S, sub)
    L_pad = _ceil_to(L, 128)
    HW_pad = _ceil_to(HW, 128)

    # Free contiguous reshape (no transpose): lane-dense per-channel slab.
    xr = x.reshape(N, C, S, L)
    # The slice plane feeds the kernel through its own small BlockSpec (works for any
    # slice_idx, no sublane-alignment requirement).  Extra HBM ~ 2/T of one pass.
    xsl = lax.slice_in_dim(x, slice_idx, slice_idx + 1, axis=2).reshape(N, C, 1, HW)

    weight = weight.astype(jnp.float32)
    bias = bias.astype(jnp.float32)

    capacity = _vmem_capacity_bytes()
    vmem_limit = int(0.85 * capacity)
    margin = 2 << 20

    slab_bytes = N * S_pad * L_pad * esize            # one padded channel slab
    slice_bytes = N * sub * HW_pad * esize            # padded slice-plane block (tiny)
    sample_tmp = 3 * _ceil_to(S, 8) * L_pad * 4       # per-sample f32 temps in the loops
    # 2x double-buffered input + 2x double-buffered output + slice + loop temps + margin.
    fused_need = 4 * slab_bytes + 2 * slice_bytes + sample_tmp + margin

    if fused_need <= vmem_limit and not force_tiled:
        kernel = functools.partial(_bn_fused_kernel, prior=float(prior), eps=float(eps))
        out = pl.pallas_call(
            kernel,
            out_shape=jax.ShapeDtypeStruct((N, C, S, L), x.dtype),
            grid_spec=pltpu.PrefetchScalarGridSpec(
                num_scalar_prefetch=0,
                grid=(C,),
                in_specs=[
                    pl.BlockSpec(memory_space=pltpu.SMEM),                 # weight (C,)
                    pl.BlockSpec(memory_space=pltpu.SMEM),                 # bias   (C,)
                    pl.BlockSpec((N, 1, S, L), lambda c: (0, c, 0, 0)),    # x channel slab
                    pl.BlockSpec((N, 1, 1, HW), lambda c: (0, c, 0, 0)),   # slice plane
                ],
                out_specs=pl.BlockSpec((N, 1, S, L), lambda c: (0, c, 0, 0)),
            ),
            compiler_params=pltpu.CompilerParams(
                dimension_semantics=("parallel",),
                vmem_limit_bytes=vmem_limit),
        )(weight, bias, xr, xsl)
        return out.reshape(N, C, T, H, W)

    # --------------------- tiled two-pass path (3 HBM passes) ---------------------
    per_sample_bytes = S_pad * L_pad * esize
    budget = max(0, vmem_limit - margin - 2 * slice_bytes - sample_tmp)
    nb_cap = max(1, budget // (4 * per_sample_bytes))
    Nb = _largest_divisor_leq(N, nb_cap)
    K = N // Nb
    # TODO(synk): if even a single (1,1,S,L) slab exceeds the VMEM budget, the stats and
    # normalize passes would also need an S-tile grid axis; not needed for realistic shapes.

    stats = pl.pallas_call(
        _bn_stats_kernel,
        out_shape=jax.ShapeDtypeStruct((C, K, 8, 128), jnp.float32),
        grid_spec=pltpu.PrefetchScalarGridSpec(
            num_scalar_prefetch=0,
            grid=(C, K),
            in_specs=[
                pl.BlockSpec((Nb, 1, S, L), lambda c, j: (j, c, 0, 0)),
                pl.BlockSpec((Nb, 1, 1, HW), lambda c, j: (j, c, 0, 0)),
            ],
            out_specs=pl.BlockSpec((1, 1, 8, 128), lambda c, j: (c, j, 0, 0)),
        ),
        compiler_params=pltpu.CompilerParams(
            dimension_semantics=("parallel", "parallel"),
            vmem_limit_bytes=vmem_limit),
    )(xr, xsl)

    # Tiny O(C*K) wrapper math: Chan's parallel-variance combine of per-chunk partials.
    s_f, m2_f = stats[:, :, 0, 0], stats[:, :, 1, 0]        # (C, K)
    s_s, m2_s = stats[:, :, 2, 0], stats[:, :, 3, 0]
    cnt_f, cnt_s = float(Nb * THW), float(Nb * HW)
    tot_f, tot_s = float(N * THW), float(N * HW)
    mean_f = s_f.sum(axis=1) / tot_f
    mean_s = s_s.sum(axis=1) / tot_s
    var_f = (m2_f + cnt_f * (s_f / cnt_f - mean_f[:, None]) ** 2).sum(axis=1) / (tot_f - 1.0)
    var_s = (m2_s + cnt_s * (s_s / cnt_s - mean_s[:, None]) ** 2).sum(axis=1) / (tot_s - 1.0)
    mean = prior * mean_f + (1.0 - prior) * mean_s
    var = prior * var_f + (1.0 - prior) * var_s
    scale = weight * lax.rsqrt(var + eps)
    shift = bias - mean * scale

    out = pl.pallas_call(
        _bn_norm_kernel,
        out_shape=jax.ShapeDtypeStruct((N, C, S, L), x.dtype),
        grid_spec=pltpu.PrefetchScalarGridSpec(
            num_scalar_prefetch=0,
            grid=(C, K),
            in_specs=[
                pl.BlockSpec(memory_space=pltpu.SMEM),                   # scale (C,)
                pl.BlockSpec(memory_space=pltpu.SMEM),                   # shift (C,)
                pl.BlockSpec((Nb, 1, S, L), lambda c, j: (j, c, 0, 0)),
            ],
            out_specs=pl.BlockSpec((Nb, 1, S, L), lambda c, j: (j, c, 0, 0)),
        ),
        compiler_params=pltpu.CompilerParams(
            dimension_semantics=("parallel", "parallel"),
            vmem_limit_bytes=vmem_limit),
    )(scale, shift, xr)
    return out.reshape(N, C, T, H, W)


def _reference_forward(x, weight, bias, prior, eps=1e-5, slice_idx=8):
    """Pure-JAX reference matching the PyTorch forward."""
    x_sl = x[:, :, slice_idx]                                   # (N, C, H, W)
    mean_sl = jnp.mean(x_sl, axis=(0, 2, 3))
    var_sl = jnp.var(x_sl, axis=(0, 2, 3), ddof=1)              # unbiased (running_var update)
    mean_full = jnp.mean(x, axis=(0, 2, 3, 4))
    var_full = jnp.var(x, axis=(0, 2, 3, 4), ddof=1)
    mean = prior * mean_full + (1.0 - prior) * mean_sl
    var = prior * var_full + (1.0 - prior) * var_sl
    inv = 1.0 / jnp.sqrt(var + eps)
    bshape = (1, -1, 1, 1, 1)
    return (x - mean.reshape(bshape)) * (weight * inv).reshape(bshape) + bias.reshape(bshape)


if __name__ == "__main__":
    # NCDHW with T > 8 so input[:, :, 8] exists.  T*H*W = 1024 -> (S, L) = (8, 128).
    N, C, T, H, W = 2, 4, 16, 8, 8
    prior = 0.7
    eps = 1e-5

    key = jax.random.PRNGKey(0)
    kx, kw, kb = jax.random.split(key, 3)
    x = 1.5 * jax.random.normal(kx, (N, C, T, H, W), dtype=jnp.float32) + 0.3
    weight = 1.0 + 0.1 * jax.random.normal(kw, (C,), dtype=jnp.float32)
    bias = 0.1 * jax.random.normal(kb, (C,), dtype=jnp.float32)

    ref = _reference_forward(x, weight, bias, prior, eps=eps)

    # Main fused single-pass path (2 HBM passes).
    out = bayesian_batchnorm3d_spatial_temporal(x, weight, bias, prior=prior, eps=eps)
    out = jax.block_until_ready(out)
    assert out.shape == x.shape and out.dtype == x.dtype
    assert jnp.allclose(out, ref, atol=1e-4, rtol=1e-4), "single-pass mismatch vs. reference"

    # VMEM-safe tiled two-pass path (used automatically for very large shapes).
    out_tiled = bayesian_batchnorm3d_spatial_temporal(
        x, weight, bias, prior=prior, eps=eps, force_tiled=True)
    out_tiled = jax.block_until_ready(out_tiled)
    assert jnp.allclose(out_tiled, ref, atol=1e-4, rtol=1e-4), "tiled mismatch vs. reference"

    # bf16 I/O path: halves HBM traffic (kernel is HBM-bound); stats accumulated in f32.
    x_bf = x.astype(jnp.bfloat16)
    ref_bf = _reference_forward(x_bf.astype(jnp.float32), weight, bias, prior, eps=eps)
    out_bf = bayesian_batchnorm3d_spatial_temporal(x_bf, weight, bias, prior=prior, eps=eps)
    out_bf = jax.block_until_ready(out_bf)
    assert out_bf.dtype == jnp.bfloat16
    assert jnp.allclose(out_bf.astype(jnp.float32), ref_bf, atol=5e-2, rtol=5e-2), \
        "bf16 mismatch vs. reference"

    print("KERNEL_OK")
</pallas_src>

<mosaic_0001>
module attributes {stable_mosaic.version = 11 : i64} {
  func.func @_bn_fused_kernel(%arg0: i32, %arg1: memref<4xf32, #tpu.memory_space<smem>>, %arg2: memref<4xf32, #tpu.memory_space<smem>>, %arg3: memref<2x1x8x128xf32, #tpu.memory_space<vmem>>, %arg4: memref<2x1x1x64xf32, #tpu.memory_space<vmem>>, %arg5: memref<2x1x8x128xf32, #tpu.memory_space<vmem>>) attributes {dimension_semantics = [#tpu.dimension_semantics<parallel>], iteration_bounds = array<i64: 4>, scalar_prefetch = 0 : i64, scratch_operands = 0 : i64, tpu.core_type = #tpu.core_type<tc>, window_params = [{transform_indices = @transform_0, window_bounds = array<i64: 4>}, {transform_indices = @transform_1, window_bounds = array<i64: 4>}, {transform_indices = @transform_2, window_bounds = array<i64: 2, 1, 8, 128>}, {transform_indices = @transform_3, window_bounds = array<i64: 2, 1, 1, 64>}, {transform_indices = @transform_4, window_bounds = array<i64: 2, 1, 8, 128>}]} {
    %cst = arith.constant 0.000000e+00 : f32
    %c0_i32 = arith.constant 0 : i32
    %c2_i32 = arith.constant 2 : i32
    %0 = arith.addi %c0_i32, %c2_i32 : i32
    %c1_i32 = arith.constant 1 : i32
    %1 = scf.for %arg6 = %c0_i32 to %0 step %c1_i32 iter_args(%arg7 = %cst) -> (f32)  : i32 {
      %36 = arith.index_cast %arg6 : i32 to index
      %c0_24 = arith.constant 0 : index
      %c0_25 = arith.constant 0 : index
      %c0_26 = arith.constant 0 : index
      %37 = vector.load %arg3[%36, %c0_24, %c0_25, %c0_26] : memref<2x1x8x128xf32, #tpu.memory_space<vmem>>, vector<1x1x8x128xf32>
      %38 = vector.shape_cast %37 : vector<1x1x8x128xf32> to vector<1x8x128xf32>
      %39 = vector.shape_cast %38 : vector<1x8x128xf32> to vector<1x1x8x128xf32>
      %cst_27 = arith.constant dense<0.000000e+00> : vector<1xf32>
      %40 = vector.multi_reduction <add>, %39, %cst_27 [1, 2, 3] : vector<1x1x8x128xf32> to vector<1xf32>
      %41 = vector.shape_cast %40 : vector<1xf32> to vector<1x1x1x1xf32>
      %42 = vector.extract %41[0, 0, 0, 0] : f32 from vector<1x1x1x1xf32>
      %43 = arith.addf %arg7, %42 : f32
      scf.yield %43 : f32
    }
    %c2_i32_0 = arith.constant 2 : i32
    %cst_1 = arith.constant 2.048000e+03 : f32
    %2 = arith.divf %1, %cst_1 : f32
    %cst_2 = arith.constant 0.000000e+00 : f32
    %c0_i32_3 = arith.constant 0 : i32
    %c2_i32_4 = arith.constant 2 : i32
    %3 = arith.addi %c0_i32_3, %c2_i32_4 : i32
    %c1_i32_5 = arith.constant 1 : i32
    %4 = scf.for %arg6 = %c0_i32_3 to %3 step %c1_i32_5 iter_args(%arg7 = %cst_2) -> (f32)  : i32 {
      %36 = arith.index_cast %arg6 : i32 to index
      %c0_24 = arith.constant 0 : index
      %c0_25 = arith.constant 0 : index
      %c0_26 = arith.constant 0 : index
      %37 = vector.load %arg3[%36, %c0_24, %c0_25, %c0_26] : memref<2x1x8x128xf32, #tpu.memory_space<vmem>>, vector<1x1x8x128xf32>
      %38 = vector.shape_cast %37 : vector<1x1x8x128xf32> to vector<1x8x128xf32>
      %39 = vector.broadcast %2 : f32 to vector<1x8x128xf32>
      %40 = arith.subf %38, %39 : vector<1x8x128xf32>
      %41 = arith.mulf %40, %40 : vector<1x8x128xf32>
      %42 = vector.shape_cast %41 : vector<1x8x128xf32> to vector<1x1x8x128xf32>
      %cst_27 = arith.constant dense<0.000000e+00> : vector<1xf32>
      %43 = vector.multi_reduction <add>, %42, %cst_27 [1, 2, 3] : vector<1x1x8x128xf32> to vector<1xf32>
      %44 = vector.shape_cast %43 : vector<1xf32> to vector<1x1x1x1xf32>
      %45 = vector.extract %44[0, 0, 0, 0] : f32 from vector<1x1x1x1xf32>
      %46 = arith.addf %arg7, %45 : f32
      scf.yield %46 : f32
    }
    %c2_i32_6 = arith.constant 2 : i32
    %cst_7 = arith.constant 2.047000e+03 : f32
    %5 = arith.divf %4, %cst_7 : f32
    %c0 = arith.constant 0 : index
    %c0_8 = arith.constant 0 : index
    %c0_9 = arith.constant 0 : index
    %c0_10 = arith.constant 0 : index
    %6 = vector.load %arg4[%c0, %c0_8, %c0_9, %c0_10] : memref<2x1x1x64xf32, #tpu.memory_space<vmem>>, vector<2x1x1x64xf32>
    %7 = vector.shape_cast %6 : vector<2x1x1x64xf32> to vector<1x2x1x1x64xf32>
    %cst_11 = arith.constant dense<0.000000e+00> : vector<1xf32>
    %8 = vector.multi_reduction <add>, %7, %cst_11 [1, 2, 3, 4] : vector<1x2x1x1x64xf32> to vector<1xf32>
    %9 = vector.shape_cast %8 : vector<1xf32> to vector<1x1x1x1x1xf32>
    %10 = vector.extract %9[0, 0, 0, 0, 0] : f32 from vector<1x1x1x1x1xf32>
    %cst_12 = arith.constant 1.280000e+02 : f32
    %11 = arith.divf %10, %cst_12 : f32
    %12 = vector.broadcast %11 : f32 to vector<2x1x1x64xf32>
    %13 = arith.subf %6, %12 : vector<2x1x1x64xf32>
    %14 = arith.mulf %13, %13 : vector<2x1x1x64xf32>
    %15 = vector.shape_cast %14 : vector<2x1x1x64xf32> to vector<1x2x1x1x64xf32>
    %cst_13 = arith.constant dense<0.000000e+00> : vector<1xf32>
    %16 = vector.multi_reduction <add>, %15, %cst_13 [1, 2, 3, 4] : vector<1x2x1x1x64xf32> to vector<1xf32>
    %17 = vector.shape_cast %16 : vector<1xf32> to vector<1x1x1x1x1xf32>
    %18 = vector.extract %17[0, 0, 0, 0, 0] : f32 from vector<1x1x1x1x1xf32>
    %cst_14 = arith.constant 1.270000e+02 : f32
    %19 = arith.divf %18, %cst_14 : f32
    %cst_15 = arith.constant 0.699999988 : f32
    %20 = arith.mulf %cst_15, %2 : f32
    %cst_16 = arith.constant 3.000000e-01 : f32
    %21 = arith.mulf %cst_16, %11 : f32
    %22 = arith.addf %20, %21 : f32
    %cst_17 = arith.constant 0.699999988 : f32
    %23 = arith.mulf %cst_17, %5 : f32
    %cst_18 = arith.constant 3.000000e-01 : f32
    %24 = arith.mulf %cst_18, %19 : f32
    %25 = arith.addf %23, %24 : f32
    %26 = arith.index_cast %arg0 : i32 to index
    %27 = memref.load %arg1[%26] : memref<4xf32, #tpu.memory_space<smem>>
    %cst_19 = arith.constant 9.99999974E-6 : f32
    %28 = arith.addf %25, %cst_19 : f32
    %29 = math.rsqrt %28 : f32
    %30 = arith.mulf %27, %29 : f32
    %31 = arith.index_cast %arg0 : i32 to index
    %32 = memref.load %arg2[%31] : memref<4xf32, #tpu.memory_space<smem>>
    %33 = arith.mulf %22, %30 : f32
    %34 = arith.subf %32, %33 : f32
    %c0_i32_20 = arith.constant 0 : i32
    %c2_i32_21 = arith.constant 2 : i32
    %35 = arith.addi %c0_i32_20, %c2_i32_21 : i32
    %c1_i32_22 = arith.constant 1 : i32
    scf.for %arg6 = %c0_i32_20 to %35 step %c1_i32_22  : i32 {
      %36 = arith.index_cast %arg6 : i32 to index
      %c0_24 = arith.constant 0 : index
      %c0_25 = arith.constant 0 : index
      %c0_26 = arith.constant 0 : index
      %37 = vector.load %arg3[%36, %c0_24, %c0_25, %c0_26] : memref<2x1x8x128xf32, #tpu.memory_space<vmem>>, vector<1x1x8x128xf32>
      %38 = vector.shape_cast %37 : vector<1x1x8x128xf32> to vector<1x8x128xf32>
      %39 = vector.broadcast %30 : f32 to vector<1x8x128xf32>
      %40 = arith.mulf %38, %39 : vector<1x8x128xf32>
      %41 = vector.broadcast %34 : f32 to vector<1x8x128xf32>
      %42 = arith.addf %40, %41 : vector<1x8x128xf32>
      %43 = arith.index_cast %arg6 : i32 to index
      %c0_27 = arith.constant 0 : index
      %c0_28 = arith.constant 0 : index
      %c0_29 = arith.constant 0 : index
      %44 = vector.load %arg5[%43, %c0_27, %c0_28, %c0_29] : memref<2x1x8x128xf32, #tpu.memory_space<vmem>>, vector<1x1x8x128xf32>
      %45 = vector.shape_cast %44 : vector<1x1x8x128xf32> to vector<1x8x128xf32>
      %46 = vector.shape_cast %42 : vector<1x8x128xf32> to vector<1x1x8x128xf32>
      tpu.vector_store %arg5[%43, %c0_27, %c0_28, %c0_29], %46 {strides = array<i32>} : memref<2x1x8x128xf32, #tpu.memory_space<vmem>>, vector<1x1x8x128xf32>,
    }
    %c2_i32_23 = arith.constant 2 : i32
    return
  }
  func.func @transform_0(%arg0: i32) -> i32 {
    %c0_i32 = arith.constant 0 : i32
    %c0_i32_0 = arith.constant 0 : i32
    return %c0_i32 : i32
  }
  func.func @transform_1(%arg0: i32) -> i32 {
    %c0_i32 = arith.constant 0 : i32
    %c0_i32_0 = arith.constant 0 : i32
    return %c0_i32 : i32
  }
  func.func @transform_2(%arg0: i32) -> (i32, i32, i32, i32) {
    %c0_i32 = arith.constant 0 : i32
    %c0_i32_0 = arith.constant 0 : i32
    %c0_i32_1 = arith.constant 0 : i32
    %c0_i32_2 = arith.constant 0 : i32
    return %c0_i32, %arg0, %c0_i32_0, %c0_i32_1 : i32, i32, i32, i32
  }
  func.func @transform_3(%arg0: i32) -> (i32, i32, i32, i32) {
    %c0_i32 = arith.constant 0 : i32
    %c0_i32_0 = arith.constant 0 : i32
    %c0_i32_1 = arith.constant 0 : i32
    %c0_i32_2 = arith.constant 0 : i32
    return %c0_i32, %arg0, %c0_i32_0, %c0_i32_1 : i32, i32, i32, i32
  }
  func.func @transform_4(%arg0: i32) -> (i32, i32, i32, i32) {
    %c0_i32 = arith.constant 0 : i32
    %c0_i32_0 = arith.constant 0 : i32
    %c0_i32_1 = arith.constant 0 : i32
    %c0_i32_2 = arith.constant 0 : i32
    return %c0_i32, %arg0, %c0_i32_0, %c0_i32_1 : i32, i32, i32, i32
  }
}

</mosaic_0001>

<bundles_post_ra>
// kernel: tpu_custom_call.1
= control target key start
LH: loop header
LB: loop body
LE: loop exit
PB: predicated region body
PF: predicated region fallthrough
CT: control target
= control target key end

     0   :  { %s1161_s0 = inlined_call_operand.hbm [shape: f32[4], index: 0, kind: input, shape index: {}]   ;;  %s1162_s1 = inlined_call_operand.vmem [shape: f32[4], index: 1, kind: input, shape index: {}]   ;;  %s1163_s2 = inlined_call_operand.hbm [shape: f32[2,4,8,128], index: 2, kind: input, shape index: {}]   ;;  %s1164_s3 = inlined_call_operand.vmem [shape: f32[2,4,1,64], index: 3, kind: input, shape index: {}]   ;;  %s1165_s4 = inlined_call_operand.hbm [shape: f32[2,4,8,128], index: 4, kind: output, shape index: {}]  }
   0x1   :  { %1170 = sst [smem:[#allocation17_spill]] %s1161_s0 }
   0x2   :  { %1171 = sst [smem:[#allocation18_spill]] %s1162_s1 }
   0x3   :  { %1172 = sst [smem:[#allocation19_spill]] %s1163_s2 }
   0x4   :  { %1173 = sst [smem:[#allocation20_spill]] %s1164_s3 }
   0x5   :  { %9 = vsyncpa [#allocation5], 0 }
   0x6   :  { %10 = vsyncpa [#allocation6], 0 }
   0x7   :  { %11 = vsyncpa [#allocation3], 0 }
   0x8   :  { %13 = vsyncpa [#allocation3 + $0x1], 0 }
   0x9   :  { %14 = vsyncpa [#allocation4], 0 }
   0xa   :  { %16 = vsyncpa [#allocation4 + $0x1], 0  ;;  %s917_s15 = smov 0   ;;  %s919_s16 = smov 0  }
   0xb   :  { %s921_s17 = smov 0   ;;  %s923_s18 = smov 0  }
   0xc LB: > { %1174 = sst [smem:[#allocation15_spill]] %s856_s17  ;;  %s938_s19 = sadd.s32 4294967295, %s860_s18   ;;  %s860_s18 = sphi %s923_s18, %s1199_s18   ;;  %s856_s17 = sphi %s921_s17, %s1196_s17   ;;  %s852_s16 = sphi %s919_s16, %s1198_s16   ;;  %s848_s15 = sphi %s917_s15, %s1197_s15  }
   0xd   : > { %s569_s20 = sadd.s32 4294967294, %s860_s18   ;;  %s942_s21 = sadd.s32 1, %s860_s18  }
   0xe   : > { %s71_s22 = sadd.s32 1, %s856_s17  ;;  %s68_s23 = ssub.s32 %s860_s18, %s942_s21 }
   0xf   : > { %p78_p0 = scmp.ne.s32.totalorder %s856_s17, %s852_s16  ;;  %p69_p1 = scmp.eq.s32.totalorder %s68_s23, 0 }
  0x10   : > { %p79_p2 = scmp.eq.s32.totalorder %s860_s18, 0  ;;  %p84_p3 = scmp.ne.s32.totalorder %s852_s16, %s848_s15 }
  0x11   : > { %p1166_p4 = scmp.eq.s32.totalorder %s938_s19, 0  ;;  %p134_p7 = scmp.eq.s32.totalorder %s938_s19, 3 }
  0x12   : > { %s954_s24 = scalar_select %p69_p1, %s856_s17, %s71_s22  }
  0x13   : > { %p956_p5 = por %p79_p2, %p78_p0  ;;  %p962_p6 = por %p1166_p4, %p84_p3 }
  0x14   : > { %1175 = sst [smem:[#allocation16_spill]] %s954_s24  ;;  %p140_p8 = scmp.eq.s32.totalorder %s569_s20, 3 }
  0x15   : > { %s1177_s26 = scalar_select %p962_p6, 1, 0 }
  0x16   : > { %p570_p9 = scmp.ge.s32.totalorder %s860_s18, 1  ;;  %p147_p10 = scmp.lt.s32.totalorder %s860_s18, 5 }
  0x17   : > { %p969_p11 = por %p134_p7, %p78_p0  ;;  %p973_p12 = por %p140_p8, %p84_p3 }
  0x18   : > { %p977_p13 = pnand %p570_p9, %p147_p10  ;;  %s1181_s1 = sld [smem:[#allocation18_spill]] }
  0x19   : > { %s1178_s27 = scalar_select %p969_p11, 1, 0 }
  0x1a   : > { %s1179_s28 = scalar_select %p973_p12, 1, 0 }
  0x1b   : > { %p612_p1 = pneg %p977_p13  ;;  %s1183_s0 = sld [smem:[#allocation17_spill]] }
  0x1d   : > { %p988_p0 = pnand %p612_p1, %p1166_p4 }
  0x1e   : > { %s169_s6 = sshll.u32 %s1181_s1, 4  ;;  %s170_s6 = int_to_ptr.vmem [resolvable:$true] %s169_s6 }
  0x1f   : > { %p712_p3 = pneg %p988_p0 }
  0x21   : > { %s710_s10 = scalar_lea.hbm %s1183_s0, 16 }
  0x22   : > { %p711_p2 = scmp.ne.s32.totalorder %s1183_s0, %s710_s10  ;;  %p717_p9 = scmp.lt.u32.totalorder %s710_s10, %s1183_s0 }
  0x24   : > { %p713_p7 = pnand %p712_p3, %p711_p2 }
  0x26   : > { %p714_p8 = pneg %p713_p7 }
  0x28   : > { %p719_p10 = pnand %p717_p9, %p714_p8 }
  0x2a   : > { %722 = shalt.err (!%p719_p10)
}
  0x2b   : > { %s882_s20 = smov [#allocation2]   ;;  %s723_s30 = scalar_lea.vmem %s170_s6, 16 }
  0x2c   : > { %615 = dma.hbm_to_smem (!%p988_p0), %s1183_s0, 16, %s882_s20, [#allocation5]  }
  0x2d   : > { %p724_p1 = scmp.ne.s32.totalorder %s170_s6, %s723_s30  ;;  %p731_p11 = scmp.lt.s32.totalorder %s170_s6, %s170_s6 }
  0x2e   : > { %p732_p2 = scmp.lt.s32.totalorder %s723_s30, %s723_s30 }
  0x2f   : > { %p726_p4 = pnand %p724_p1, %p712_p3 }
  0x30   : > { %p733_p7 = por %p732_p2, %p731_p11 }
  0x31   : > { %p727_p12 = pneg %p726_p4 }
  0x33   : > { %p734_p6 = pnand %p733_p7, %p727_p12 }
  0x35   : > { %737 = shalt.err (!%p734_p6)
}
  0x36   : > { %s883_s5 = smov [#allocation7]   ;;  %p573_p8 = scmp.ge.s32.totalorder %s860_s18, 4 }
  0x37   : > { %618 = dma.vmem_to_smem (!%p988_p0), %s170_s6, 16, %s883_s5, [#allocation6]  }
  0x38   : > { %176 = sbr.rel (%p573_p8) target bundleno = 97 (0x61), region = 24  ;;  %s1012_s8 = sand.u32 (!%p573_p8), 1, %s856_s17  }
  0x39   : > { %s575_s9 = sshll.u32 (!%p573_p8), %s860_s18, 7  ;;  %s574_s10 = sshll.u32 (!%p573_p8), %s1012_s8, 4 }
  0x3a   : > { %s1184_s2 = sld [smem:[#allocation19_spill]] (!%p573_p8)  ;;  %s184_s6 = scalar_lea.vmem (!%p573_p8), [#allocation8], %s574_s10 }
  0x3b   : > { %s190_s7 = sshll.u32 (!%p573_p8), %s184_s6, 4  ;;  %s181_s14 = scalar_lea.sflag (!%p573_p8), [#allocation3], %s1012_s8  ;;  %s1021_s7 = int_to_ptr.vmem [resolvable:$true] %s190_s7 }
  0x40   : > { %s1019_s13 = scalar_lea.hbm %s1184_s2, %s575_s9  ;;  %s742_s30 = scalar_lea.hbm %s1184_s2, 1024 }
  0x41   : > { %s738_s20 = scalar_lea.hbm %s1019_s13, 256  ;;  %p743_p12 = scmp.lt.u32.totalorder %s1019_s13, %s1184_s2 }
  0x42   : > { %p739_p4 = scmp.ne.s32.totalorder %s1019_s13, %s738_s20  ;;  %p744_p0 = scmp.lt.u32.totalorder %s742_s30, %s738_s20 }
  0x43   : > { %p746_p9 = scmp.lt.u32.totalorder %s738_s20, %s1019_s13 }
  0x44   : > { %p740_p6 = pnand %p739_p4, %p956_p5  ;;  %p745_p3 = por %p744_p0, %p743_p12 }
  0x46   : > { %p741_p11 = pneg %p740_p6  ;;  %p747_p10 = por %p746_p9, %p745_p3 }
  0x48   : > { %p748_p1 = pnand %p747_p10, %p741_p11 }
  0x4a   : > { %751 = shalt.err (!%p748_p1)
}
  0x4b   : > { %s752_s10 = scalar_lea.vmem %s1021_s7, 256  ;;  %s884_s11 = smov [#allocation8]  }
  0x4c   : > { %p753_p2 = scmp.ne.s32.totalorder %s1021_s7, %s752_s10  ;;  %s756_s12 = sshll.u32 %s884_s11, 4  ;;  %s757_s12 = int_to_ptr.vmem [resolvable:$false] %s756_s12 }
  0x4d   : > { %s758_s6 = scalar_lea.vmem %s757_s12, 512  ;;  %p759_p4 = scmp.lt.s32.totalorder %s1021_s7, %s757_s12 }
  0x4e   : > { %p754_p7 = pnand %p753_p2, %p956_p5  ;;  %p760_p6 = scmp.lt.s32.totalorder %s758_s6, %s752_s10 }
  0x50   : > { %p755_p8 = pneg %p754_p7  ;;  %p761_p12 = por %p760_p6, %p759_p4 }
  0x52   : > { %p762_p0 = pnand %p761_p12, %p755_p8 }
  0x54   : > { %765 = shalt.err (!%p762_p0)
}
  0x55   : > { %s885_s20 = smov 512   ;;  %s886_s22 = smov 128  }
  0x56   : > { %s887_s23 = smov 8   ;;  %199 = sbr.rel (!%p956_p5) target bundleno = 97 (0x61), region = 32 }
  0x57   : > { %604 = dma.hbm_to_vmem [thread:$0]  (%p956_p5), %s1019_s13, 256, %s1021_s7, %s181_s14, %s885_s20, %s886_s22, %s887_s23  }
  0x58   : > { %s576_s30 = sshll.u32 (%p956_p5), %s1012_s8, 1  ;;  %s1185_s3 = sld [smem:[#allocation20_spill]] (%p956_p5) }
  0x59   : > { %s203_s11 = scalar_lea.vmem (%p956_p5), [#allocation9], %s576_s30 }
  0x5e   : > { %s204_s10 = scalar_lea.vmem %s1185_s3, %s860_s18 }
  0x5f   : > { %v220_v0 = vld [vmem:[%s204_s10] sm:$0x1]  ;;  %v222_v1 = vld [vmem:[%s204_s10 + $0x4] sm:$0x1] }
  0x60   : > { %221 = vst [vmem:[%s203_s11] sm:$0x1] %v220_v0  ;;  %223 = vst [vmem:[%s203_s11 + $0x1] sm:$0x1] %v222_v1 }
  0x61 PF: > { %245 = sbr.rel (%p977_p13) target bundleno = 864 (0x360), region = 66  ;;  %p1186_p11 = scmp.eq.s32.totalorder (!%p977_p13), %s938_s19, 0 }
  0x68   : > { %831 = dma.done.wait (%p1186_p11), [#allocation5], 16   ;;  %p1187_p5 = pmov %p1186_p11 }
  0x6a   : > { %833 = vsyncadd (%p1187_p5), [#allocation5], 4294967280  ;;  %p1188_p3 = pmov %p1187_p5 }
  0x6c   : > { %835 = dma.done.wait (%p1188_p3), [#allocation6], 16   ;;  %p1189_p9 = pmov %p1188_p3 }
  0x6d   : > { %s1065_s25 = sand.u32 1, %s852_s16   ;;  %p1190_p13 = scmp.ne.s32.totalorder %s1177_s26, 0 }
  0x6e   : > { %837 = vsyncadd (%p1189_p9), [#allocation6], 4294967280  ;;  %s580_s29 = sshll.u32 %s1065_s25, 4  ;;  %s256_s8 = scalar_lea.sflag [#allocation3], %s1065_s25 }
  0x6f   : > { %s1069_s13 = scalar_lea.vmem [#allocation8], %s580_s29 }
  0x70   : > { %839 = dma.done.wait (%p1190_p13), %s256_s8, 256  }
  0x71   : > { %841 = vsyncadd (%p1190_p13), %s256_s8, 4294967040  ;;  %s581_s7 = sshll.u32 %s1065_s25, 1 }
  0x72   : > { %s1076_s14 = scalar_lea.vmem [#allocation9], %s581_s7 }
  0x73   : > { %271 = sfence }
  0x74   : > { %s1078_s12 = scalar_lea.vmem [#allocation10], %s580_s29  ;;  %s862_s6 = smov 0.0  }
  0x75   : > { %s866_s20 = smov 0  }
  0x76 LB: >> { %s583_s22 = sshll.u32 %s868_s20, 3  ;;  %s301_s20 = sadd.s32 1, %s868_s20   ;;  %s868_s20 = sphi %s866_s20, %s301_s20   ;;  %s864_s6 = sphi %s862_s6, %s863_s6  }
  0x77   : >> { %s304_s23 = scalar_lea.vmem %s1069_s13, %s583_s22 [#allocation8]  ;;  %p298_p10 = scmp.ge.s32.totalorder %s301_s20, 2  }
  0x78   : >> { %v305_v2 = vld [vmem:[%s304_s23] sm:$0xff]  ;;  %s870_s9 = smov (%p298_p10), 0.0   ;;  %s874_s10 = smov (%p298_p10), 0  }
  0x79   : >> { %306 = vadd.xlane.f32.xlu0 %v305_v2 }
 0x106   : >> { %v307_v3 = vpop.xlane.xlu0 %306 }
 0x107   : >> { %v308_v4 = vrot.slane %v307_v3, 4 }
 0x109   : >> { %v309_v5 = vadd.f32 %v308_v4, %v307_v3 }
 0x10b   : >> { %v310_v6 = vrot.slane %v309_v5, 2 }
 0x10d   : >> { %v311_v7 = vadd.f32 %v310_v6, %v309_v5 }
 0x10f   : >> { %v312_v8 = vrot.slane %v311_v7, 1 }
 0x111   : >> { %v313_v9 = vadd.f32 %v312_v8, %v311_v7 }
 0x113   : >> { %590 = vpush %v313_v9 }
 0x142   : > { %300 = sbr.rel (!%p298_p10) target bundleno = 118 (0x76), region = 158 }
 0x144   : >> { %s591_s26 = spop %590 }
 0x145   : >> { %s1081_s6 = sadd.f32 %s864_s6, %s591_s26  }
 0x147   : >> { %s1191_s30 = smov %s1081_s6 }
 0x148   : >> { %s863_s6 = smov %s1191_s30   ;;  %s318_s5 = smul.f32 (%p298_p10), 0.00048828125, %s1191_s30 }
 0x149 LB: >> { %s584_s11 = sshll.u32 %s876_s10, 3  ;;  %s324_s10 = sadd.s32 1, %s876_s10   ;;  %s876_s10 = sphi %s874_s10, %s324_s10   ;;  %s872_s9 = sphi %s870_s9, %s871_s9  }
 0x14a   : >> { %v329_v10 = vstv %s318_s5  ;;  %s327_s29 = scalar_lea.vmem %s1069_s13, %s584_s11 [#allocation8]  ;;  %p321_p1 = scmp.ge.s32.totalorder %s324_s10, 2  }
 0x14b   : >> { %v328_v11 = vld [vmem:[%s327_s29] sm:$0xff]  ;;  %v345_v21 = vld [vmem:[%s1076_s14] sm:$0x1] (%p321_p1)  ;;  %v346_v22 = vld [vmem:[%s1076_s14 + $0x1] sm:$0x1] (%p321_p1)  ;;  %vm347_vm0 = vcmask (%p321_p1), 516096  }
 0x14c   : >> { %v330_v12 = vsub.f32 %v328_v11, %v329_v10  ;;  %v348_v23 = vsel (%p321_p1), %vm347_vm0, %v345_v21, 0.0  ;;  %v349_v24 = vsel (%p321_p1), %vm347_vm0, %v346_v22, 0.0  ;;  %s389_s29 = sld [smem:[#allocation2 + %s938_s19]] (%p321_p1) }
 0x14d   : > { %v350_v25 = vadd.f32 (%p321_p1), %v349_v24, %v348_v23  ;;  %s395_s1 = sld [smem:[#allocation7 + %s938_s19]] (%p321_p1) }
 0x14e   : >> { %v331_v13 = vmul.f32 %v330_v12, %v330_v12 }
 0x150   : >> { %332 = vadd.xlane.f32.xlu0 %v331_v13 }
 0x154   : > { %351 = vadd.xlane.f32.xlu0 (%p321_p1), %v350_v25 }
 0x1dd   : >> { %v333_v14 = vpop.xlane.xlu0 %332 }
 0x1de   : >> { %v334_v15 = vrot.slane %v333_v14, 4 }
 0x1e0   : >> { %v335_v16 = vadd.f32 %v334_v15, %v333_v14 }
 0x1e1   : > { %v352_v26 = vpop.xlane.xlu0 (%p321_p1), %351 }
 0x1e2   : >> { %v336_v17 = vrot.slane %v335_v16, 2  ;;  %v353_v27 = vrot.slane (%p321_p1), %v352_v26, 4 }
 0x1e4   : >> { %v337_v18 = vadd.f32 %v336_v17, %v335_v16  ;;  %v354_v28 = vadd.f32 (%p321_p1), %v353_v27, %v352_v26 }
 0x1e6   : >> { %v338_v19 = vrot.slane %v337_v18, 1  ;;  %v355_v29 = vrot.slane (%p321_p1), %v354_v28, 2 }
 0x1e8   : >> { %v339_v20 = vadd.f32 %v338_v19, %v337_v18  ;;  %v356_v30 = vadd.f32 (%p321_p1), %v355_v29, %v354_v28 }
 0x1ea   : >> { %592 = vpush %v339_v20  ;;  %v357_v31 = vrot.slane (%p321_p1), %v356_v30, 1 }
 0x1ec   : > { %v358_v32 = vadd.f32 (%p321_p1), %v357_v31, %v356_v30 }
 0x1ee   : > { %594 = vpush (%p321_p1), %v358_v32 }
 0x219   : > { %323 = sbr.rel (!%p321_p1) target bundleno = 329 (0x149), region = 169 }
 0x21b   : >> { %s593_s8 = spop %592 }
 0x21c   : >> { %s1088_s9 = sadd.f32 %s872_s9, %s593_s8   ;;  %s383_s8 = smul.f32 (%p321_p1), 0.7, %s318_s5 }
 0x21e   : >> { %s1192_s7 = smov %s1088_s9 }
 0x21f   : >> { %s871_s9 = smov %s1192_s7   ;;  %s1095_s6 = spop (%p321_p1), %594 }
 0x220   : > { %s362_s14 = smul.f32 0.0078125, %s1095_s6 }
 0x221   : > { %s344_s20 = smul.f32 0.0004885198, %s1192_s7 }
 0x222   : > { %v363_v33 = vstv %s362_s14  ;;  %s384_s0 = smul.f32 0.3, %s362_s14 }
 0x223   : > { %v364_v34 = vsub.f32 %v345_v21, %v363_v33  ;;  %v365_v35 = vsub.f32 %v346_v22, %v363_v33  ;;  %s386_s23 = smul.f32 0.7, %s344_s20  ;;  %s878_s20 = smov 0  }
 0x224   : > { %s385_s3 = sadd.f32 %s384_s0, %s383_s8 }
 0x225   : > { %v366_v36 = vmul.f32 %v364_v34, %v364_v34  ;;  %v367_v37 = vmul.f32 %v365_v35, %v365_v35 }
 0x227   : > { %v368_v38 = vsel %vm347_vm0, %v366_v36, 0.0  ;;  %v369_v39 = vsel %vm347_vm0, %v367_v37, 0.0 }
 0x228   : > { %v370_v40 = vadd.f32 %v369_v39, %v368_v38 }
 0x22a   : > { %371 = vadd.xlane.f32.xlu0 %v370_v40 }
 0x2b7   : > { %v372_v41 = vpop.xlane.xlu0 %371 }
 0x2b8   : > { %v373_v42 = vrot.slane %v372_v41, 4 }
 0x2ba   : > { %v374_v43 = vadd.f32 %v373_v42, %v372_v41 }
 0x2bc   : > { %v375_v44 = vrot.slane %v374_v43, 2 }
 0x2be   : > { %v376_v45 = vadd.f32 %v375_v44, %v374_v43 }
 0x2c0   : > { %v377_v46 = vrot.slane %v376_v45, 1 }
 0x2c2   : > { %v378_v47 = vadd.f32 %v377_v46, %v376_v45 }
 0x2c4   : > { %596 = vpush %v378_v47 }
 0x2f5   : > { %s597_s22 = spop %596 }
 0x2f6   : > { %s382_s26 = smul.f32 0.007874016, %s597_s22 }
 0x2f8   : > { %s387_s9 = smul.f32 0.3, %s382_s26 }
 0x2fa   : > { %s388_s10 = sadd.f32 %s387_s9, %s386_s23 }
 0x2fc   : > { %s390_s11 = sadd.f32 1e-05, %s388_s10 }
 0x2fe   : > { %v391_v48 = vstv %s390_s11 }
 0x2ff   : > { %708 = vrsqrt.f32 %v391_v48 }
 0x309   : > { %v709_v49 = vpop.eup %708 }
 0x30a   : > { %598 = vpush %v709_v49 }
 0x33b   : > { %s599_s2 = spop %598 }
 0x33c   : > { %s394_s24 = smul.f32 %s599_s2, %s389_s29 }
 0x33e   : > { %s396_s7 = smul.f32 %s394_s24, %s385_s3 }
 0x340   : > { %s397_s17 = ssub.f32 %s395_s1, %s396_s7 }
 0x341 LB: >> { %s585_s22 = sshll.u32 %s880_s20, 3  ;;  %v407_v50 = vstv %s394_s24  ;;  %s403_s20 = sadd.s32 1, %s880_s20   ;;  %s880_s20 = sphi %s878_s20, %s403_s20  }
 0x342   : >> { %s405_s23 = scalar_lea.vmem %s1069_s13, %s585_s22 [#allocation8]  ;;  %v409_v52 = vstv %s397_s17  ;;  %s411_s30 = scalar_lea.vmem %s1078_s12, %s585_s22 [#allocation10] }
 0x343   : >> { %v406_v51 = vld [vmem:[%s405_s23] sm:$0xff]  ;;  %p400_p2 = scmp.ge.s32.totalorder %s403_s20, 2  }
 0x344   : >> { %v408_v53 = vmul.f32 %v407_v50, %v406_v51  ;;  %s587_s0 = sshll.u32 (%p400_p2), %s938_s19, 7  ;;  %s426_s5 = sshll.u32 (%p400_p2), %s1078_s12, 4  ;;  %s1118_s5 = int_to_ptr.vmem [resolvable:$true] %s426_s5 }
 0x345   : > { %402 = sbr.rel (!%p400_p2) target bundleno = 833 (0x341), region = 180  ;;  %s1115_s3 = scalar_lea.hbm (%p400_p2), %s1165_s4, %s587_s0 }
 0x346   : >> { %v410_v54 = vadd.f32 %v409_v52, %v408_v53  ;;  %s414_s6 = scalar_lea.sflag (%p400_p2), [#allocation4], %s1065_s25  ;;  %s766_s14 = scalar_lea.vmem (%p400_p2), %s1118_s5, 256 }
 0x347   : > { %p767_p7 = scmp.ne.s32.totalorder (%p400_p2), %s1118_s5, %s766_s14  ;;  %p1193_p8 = scmp.ne.s32.totalorder (%p400_p2), %s1178_s27, 0 }
 0x348   : >> { %412 = vst [vmem:[%s411_s30] sm:$0xff] %v410_v54  ;;  %s888_s17 = smov (%p400_p2), [#allocation10]  }
 0x349   : > { %p768_p4 = pnand (%p400_p2), %p767_p7, %p1193_p8  ;;  %s770_s24 = sshll.u32 (%p400_p2), %s888_s17, 4  ;;  %s771_s24 = int_to_ptr.vmem [resolvable:$false] %s770_s24 }
 0x34a   : > { %s772_s19 = scalar_lea.vmem (%p400_p2), %s771_s24, 512  ;;  %p773_p12 = scmp.lt.s32.totalorder (%p400_p2), %s1118_s5, %s771_s24 }
 0x34b   : > { %p769_p6 = pneg (%p400_p2), %p768_p4  ;;  %p774_p0 = scmp.lt.s32.totalorder (%p400_p2), %s772_s19, %s766_s14 }
 0x34d   : > { %p775_p11 = por %p774_p0, %p773_p12 }
 0x34f   : > { %p776_p5 = pnand %p775_p11, %p769_p6 }
 0x351   : > { %779 = shalt.err (!%p776_p5)
}
 0x352   : > { %s780_s13 = scalar_lea.hbm %s1115_s3, 256  ;;  %s784_s9 = scalar_lea.hbm %s1165_s4, 1024 }
 0x353   : > { %p781_p3 = scmp.ne.s32.totalorder %s1115_s3, %s780_s13  ;;  %p785_p10 = scmp.lt.u32.totalorder %s1115_s3, %s1165_s4 }
 0x354   : > { %p786_p1 = scmp.lt.u32.totalorder %s784_s9, %s780_s13  ;;  %p788_p7 = scmp.lt.u32.totalorder %s780_s13, %s1115_s3 }
 0x355   : > { %p782_p9 = pnand %p781_p3, %p1193_p8 }
 0x356   : > { %p787_p2 = por %p786_p1, %p785_p10 }
 0x357   : > { %p783_p13 = pneg %p782_p9 }
 0x358   : > { %p789_p4 = por %p788_p7, %p787_p2 }
 0x35a   : > { %p790_p6 = pnand %p789_p4, %p783_p13 }
 0x35c   : > { %793 = shalt.err (!%p790_p6)
}
 0x35d   : > { %s889_s29 = smov 128   ;;  %s890_s8 = smov 512  }
 0x35e   : > { %s891_s7 = smov 8  }
 0x35f   : > { %610 = dma.vmem_to_hbm [thread:$0]  (%p1193_p8), %s1118_s5, 256, %s1115_s3, %s414_s6, %s889_s29, %s890_s8, %s891_s7  }
 0x360 PF: > { %p627_p12 = scmp.ge.s32.totalorder %s860_s18, 2  ;;  %s441_s20 = sand.u32 1, %s848_s15  }
 0x361   : > { %p1194_p0 = scmp.ne.s32.totalorder %s1179_s28, 0  ;;  %s442_s22 = scalar_lea.sflag [#allocation4], %s441_s20 }
 0x363   : > { %p620_p11 = pnand %p627_p12, %p1194_p0 }
 0x365   : > { %843 = dma.done.wait (!%p620_p11), %s442_s22, 256  }
 0x366   : > { %845 = vsyncadd (!%p620_p11), %s442_s22, 4294967040  ;;  %s1195_s23 = sld [smem:[#allocation15_spill]]  ;;  %s1196_s17 = sld [smem:[#allocation16_spill]] }
 0x367   : > { %p19_p5 = scmp.ge.s32.totalorder %s942_s21, 6   ;;  %s1197_s15 = smov %s852_s16 }
 0x368   : > { %s1199_s18 = smov %s942_s21 }
 0x369   :  { %21 = sbr.rel (!%p19_p5) target bundleno = 12 (0xc), region = 191 }
 0x36c   : > { %s1198_s16 = smov %s1195_s23 }
 0x370   :  { %447 = vsyncpa [#allocation3], 1 }
 0x371   :  { %449 = vsyncpa [#allocation3 + $0x1], 1 }
 0x372   :  { %450 = vsyncpa [#allocation4], 1 }
 0x373   :  { %452 = vsyncpa [#allocation4 + $0x1], 1 }
 0x374   :  { %453 = vsyncpa [#allocation5], 1 }
 0x375   :  { %455 = vsyncpa [#allocation5 + $0x1], 1 }
 0x376   :  { %456 = vsyncpa [#allocation6], 1 }
 0x377   :  { %458 = vsyncpa [#allocation6 + $0x1], 1 }

</bundles_post_ra>
